<compile_context>
chip_gen: v5e
topology: v5e:2x2
jax: 0.10.0
libtpu: 0.0.40
codegen_flags: <defaults>
</compile_context>

<pallas_src>
import jax
import jax.numpy as jnp
from jax.experimental import pallas as pl
from jax.experimental.pallas import tpu as pltpu

INPUT_DIM = 1
OUTPUT_DIM = 1
LANES = 128      # vreg lane width
SUBLANES = 8     # vreg sublane count


def _round_up(x, m):
    return ((x + m - 1) // m) * m


def affine_kernel(x_ref, w_ref, b_ref, o_ref):
    # w/b live in SMEM as (1, 1) scalars; x/o are lane-dense VMEM tiles.
    w = w_ref[0, 0]
    b = b_ref[0, 0]
    o_ref[...] = x_ref[...] * w + b          # single VPU fma per vreg, no MXU


def linear_forward(x, w, b, *, tile_rows=2048):
    """x: (B, 1) f32, w: (1, 1) f32, b: (1,) f32  ->  (B, 1) f32."""
    B, in_dim = x.shape
    out_dim = w.shape[0]
    assert in_dim == 1 and out_dim == 1, "scalar-affine fast path for this module"
    # TODO(synk): a general (in_dim, out_dim) > 1 linear would need the tiled
    # MXU matmul path (batch/K/N grid + f32 VMEM accumulator); not needed here.

    n = B * out_dim
    rows = pl.cdiv(n, LANES)                 # number of 128-lane rows
    n_lane_pad = rows * LANES

    if n_lane_pad == n:
        # B % 128 == 0: contiguous reshape is a layout no-op, zero extra HBM traffic.
        x_slab = x.reshape(rows, LANES)
        padded = False
    else:
        # Pad only to the lane boundary (at most 127 extra elements).
        x_slab = jnp.pad(x.reshape(-1), (0, n_lane_pad - n)).reshape(rows, LANES)
        padded = True

    # Tile selection: big tiles to amortize per-step overhead, but keep >= 2
    # grid steps when there's enough work so both v7x TensorCores participate.
    if rows < 2 * SUBLANES:
        tr = rows                            # single block == full array (layout-exempt)
    else:
        tr = min(tile_rows, _round_up(pl.cdiv(rows, 2), SUBLANES))
    num_blocks = pl.cdiv(rows, tr)           # partial tail block is masked by Pallas

    out_slab = pl.pallas_call(
        affine_kernel,
        out_shape=jax.ShapeDtypeStruct((rows, LANES), x.dtype),
        grid_spec=pl.GridSpec(
            grid=(num_blocks,),
            in_specs=[
                pl.BlockSpec((tr, LANES), lambda i: (i, 0)),                 # x slab tile
                pl.BlockSpec(memory_space=pltpu.MemorySpace.SMEM),           # w scalar
                pl.BlockSpec(memory_space=pltpu.MemorySpace.SMEM),           # b scalar
            ],
            out_specs=pl.BlockSpec((tr, LANES), lambda i: (i, 0)),
        ),
        compiler_params=pltpu.CompilerParams(
            dimension_semantics=("parallel",),   # independent row tiles (v7x 2-TC)
        ),
        cost_estimate=pl.CostEstimate(
            flops=2 * rows * LANES,
            transcendentals=0,
            bytes_accessed=2 * 4 * rows * LANES,   # 1 read + 1 write, f32
        ),
        # Donate the padded slab (a temporary) to the output; skip when the
        # slab is just a reshape view of the caller's (non-donated) input.
        input_output_aliases=({0: 0} if padded else {}),
    )(x_slab, w.reshape(1, 1), b.reshape(1, 1))

    if padded:
        return out_slab.reshape(-1)[:n].reshape(B, out_dim)
    return out_slab.reshape(B, out_dim)


if __name__ == "__main__":
    key = jax.random.PRNGKey(0)
    kx, kw, kb = jax.random.split(key, 3)

    # Deterministic parameter init (mimics nn.Linear uniform(-1/sqrt(in), 1/sqrt(in))).
    bound = 1.0 / (INPUT_DIM ** 0.5)
    w = jax.random.uniform(kw, (OUTPUT_DIM, INPUT_DIM), jnp.float32, -bound, bound)
    b = jax.random.uniform(kb, (OUTPUT_DIM,), jnp.float32, -bound, bound)

    # Small example input consistent with the module: batch=8, input_dim=1.
    x = jax.random.normal(kx, (8, INPUT_DIM), jnp.float32)

    fwd = jax.jit(linear_forward)
    out = fwd(x, w, b)
    out = jax.block_until_ready(out)

    # Reference check in plain JAX.
    ref = x @ w.T + b
    assert out.shape == (8, OUTPUT_DIM)
    assert jnp.allclose(out, ref, atol=1e-5), "mismatch vs reference"

    print("KERNEL_OK")
</pallas_src>

<mosaic_0001>
module attributes {stable_mosaic.version = 11 : i64} {
  func.func @affine_kernel(%arg0: i32, %arg1: memref<1x128xf32, #tpu.memory_space<vmem>>, %arg2: memref<1x1xf32, #tpu.memory_space<smem>>, %arg3: memref<1x1xf32, #tpu.memory_space<smem>>, %arg4: memref<1x128xf32, #tpu.memory_space<vmem>>) attributes {dimension_semantics = [#tpu.dimension_semantics<parallel>], iteration_bounds = array<i64: 1>, scalar_prefetch = 0 : i64, scratch_operands = 0 : i64, tpu.core_type = #tpu.core_type<tc>, window_params = [{transform_indices = @transform_0, window_bounds = array<i64: 1, 128>}, {transform_indices = @transform_1, window_bounds = array<i64: 1, 1>}, {transform_indices = @transform_2, window_bounds = array<i64: 1, 1>}, {transform_indices = @transform_3, window_bounds = array<i64: 1, 128>}]} {
    %c0 = arith.constant 0 : index
    %c0_0 = arith.constant 0 : index
    %0 = memref.load %arg2[%c0, %c0_0] : memref<1x1xf32, #tpu.memory_space<smem>>
    %c0_1 = arith.constant 0 : index
    %c0_2 = arith.constant 0 : index
    %1 = memref.load %arg3[%c0_1, %c0_2] : memref<1x1xf32, #tpu.memory_space<smem>>
    %c0_3 = arith.constant 0 : index
    %c0_4 = arith.constant 0 : index
    %2 = vector.load %arg1[%c0_3, %c0_4] : memref<1x128xf32, #tpu.memory_space<vmem>>, vector<1x128xf32>
    %3 = vector.broadcast %0 : f32 to vector<1x128xf32>
    %4 = arith.mulf %2, %3 : vector<1x128xf32>
    %5 = vector.broadcast %1 : f32 to vector<1x128xf32>
    %6 = arith.addf %4, %5 : vector<1x128xf32>
    %c0_5 = arith.constant 0 : index
    %c0_6 = arith.constant 0 : index
    %7 = vector.load %arg4[%c0_5, %c0_6] : memref<1x128xf32, #tpu.memory_space<vmem>>, vector<1x128xf32>
    tpu.vector_store %arg4[%c0_5, %c0_6], %6 {strides = array<i32>} : memref<1x128xf32, #tpu.memory_space<vmem>>, vector<1x128xf32>,
    return
  }
  func.func @transform_0(%arg0: i32) -> (i32, i32) {
    %c0_i32 = arith.constant 0 : i32
    %c0_i32_0 = arith.constant 0 : i32
    return %arg0, %c0_i32 : i32, i32
  }
  func.func @transform_1(%arg0: i32) -> (i32, i32) {
    %c0_i32 = arith.constant 0 : i32
    %c0_i32_0 = arith.constant 0 : i32
    %c0_i32_1 = arith.constant 0 : i32
    return %c0_i32, %c0_i32_0 : i32, i32
  }
  func.func @transform_2(%arg0: i32) -> (i32, i32) {
    %c0_i32 = arith.constant 0 : i32
    %c0_i32_0 = arith.constant 0 : i32
    %c0_i32_1 = arith.constant 0 : i32
    return %c0_i32, %c0_i32_0 : i32, i32
  }
  func.func @transform_3(%arg0: i32) -> (i32, i32) {
    %c0_i32 = arith.constant 0 : i32
    %c0_i32_0 = arith.constant 0 : i32
    return %arg0, %c0_i32 : i32, i32
  }
}

</mosaic_0001>

<bundles_post_ra>
// kernel: linear_forward.1
= control target key start
LH: loop header
LB: loop body
LE: loop exit
PB: predicated region body
PF: predicated region fallthrough
CT: control target
= control target key end

     0   :  { %s60_s0 = inlined_call_operand.vmem [shape: f32[1,128], index: 0, kind: input, shape index: {}, may-alias: {0,3}]   ;;  %s61_s1 = inlined_call_operand.<no memory space> [shape: f32[1,1], index: 1, kind: input, shape index: {}]   ;;  %s62_s2 = inlined_call_operand.<no memory space> [shape: f32[1,1], index: 2, kind: input, shape index: {}]   ;;  %s63_s3 = inlined_call_operand.vmem [shape: f32[1,128], index: 3, kind: output, shape index: {}, may-alias: {0,3}]  }
   0x1   :  { %v18_v0 = vld [vmem:[%s60_s0] sm:$0x1]  ;;  %v19_v1 = vstv %s61_s1  ;;  %v21_v2 = vstv %s62_s2 }
   0x2   :  { %v20_v3 = vmul.f32 %v19_v1, %v18_v0 }
   0x4   :  { %v22_v4 = vadd.f32 %v21_v2, %v20_v3 }
   0x6   :  { %23 = vst [vmem:[%s63_s3] sm:$0x1] %v22_v4 }

</bundles_post_ra>
